<compile_context>
chip_gen: v7x
topology: tpu7x:2x2x1
jax: 0.10.0
libtpu: 0.0.40
codegen_flags: <defaults>
</compile_context>

<pallas_src>
import jax
import jax.numpy as jnp
from jax import lax
from jax.experimental import pallas as pl
from jax.experimental.pallas import tpu as pltpu


def _round_up(x, m):
    return ((x + m - 1) // m) * m


def mlp_kernel(x_ref, w1_ref, b1_ref, w2_ref, b2_ref, w3_ref, b3_ref, o_ref):
    # x_ref: (TILE_B, 30) f32; cast to bf16 in-kernel (VPU cast hides under DMA).
    x = x_ref[...].astype(jnp.bfloat16)

    # fc1 + ReLU  (bf16 MXU operands, f32 accumulate; bias/ReLU in f32).
    h1 = jnp.dot(x, w1_ref[...], preferred_element_type=jnp.float32)
    h1 = jnp.maximum(h1 + b1_ref[...], 0.0)                  # (TILE_B, 128) f32

    # fc2 + ReLU.
    h2 = jnp.dot(h1.astype(jnp.bfloat16), w2_ref[...],
                 preferred_element_type=jnp.float32)
    h2 = jnp.maximum(h2 + b2_ref[...], 0.0)                  # (TILE_B, 128) f32

    # fc3 (128 -> 1): transposed-RHS matmul so the per-tile result is a
    # lane-dense (1, TILE_B) row instead of a (TILE_B, 1) column that would
    # force TILE_B/8 masked single-lane stores.  w3_ref holds w3 replicated
    # over 8 sublanes (sublane-aligned M); all rows are identical, keep row 0.
    h3 = lax.dot_general(w3_ref[...], h2,
                         dimension_numbers=(((1,), (1,)), ((), ())),
                         preferred_element_type=jnp.float32)  # (8, TILE_B)
    h3 = h3[0:1, :] + b3_ref[...]                             # (1, TILE_B)

    # Sigmoid via tanh (single EUP op, numerically stable).
    o_ref[...] = (0.5 * (jnp.tanh(0.5 * h3) + 1.0)).astype(o_ref.dtype)


def prepare_params(params):
    """One-time conversion of f32 params to kernel-ready dtypes/layouts."""
    w1, b1, w2, b2, w3, b3 = params
    return (w1.astype(jnp.bfloat16), b1,
            w2.astype(jnp.bfloat16), b2,
            jnp.tile(w3.reshape(1, 128), (8, 1)).astype(jnp.float32),  # (8,128)
            b3)


def net_forward(x, kernel_params, tile_b=1024):
    """x: (B, 30) float32. kernel_params from prepare_params(). Returns (B,1)."""
    w1, b1, w2, b2, w3r, b3 = kernel_params
    B, F = x.shape

    # Tile policy: large tiles amortize per-grid-step overhead; shrink for
    # small batches (keep a multiple of 8 sublanes) and keep >=2 tiles for
    # mid-size batches so both v7x TensorCores get work.
    if B <= tile_b:
        if B > 256:
            tile_b = max(128, _round_up(pl.cdiv(B, 2), 128))
        else:
            tile_b = max(8, _round_up(B, 8))
    grid_b = pl.cdiv(B, tile_b)

    const = lambda arr: pl.BlockSpec(arr.shape, lambda i: (0,) * arr.ndim)

    flops = 2 * grid_b * tile_b * (30 * 128 + 128 * 128 + 8 * 128)
    bytes_accessed = (int(x.size) * x.dtype.itemsize
                      + sum(int(a.size) * a.dtype.itemsize
                            for a in (w1, b1, w2, b2, w3r, b3))
                      + grid_b * tile_b * 4)

    out = pl.pallas_call(
        mlp_kernel,
        out_shape=jax.ShapeDtypeStruct((grid_b, tile_b), jnp.float32),
        grid_spec=pl.GridSpec(
            grid=(grid_b,),
            in_specs=[
                pl.BlockSpec((tile_b, F), lambda i: (i, 0)),   # x tile (f32)
                const(w1), const(b1),
                const(w2), const(b2),
                const(w3r), const(b3),
            ],
            out_specs=pl.BlockSpec((1, tile_b), lambda i: (i, 0)),
        ),
        compiler_params=pltpu.CompilerParams(
            dimension_semantics=("parallel",),
        ),
        cost_estimate=pl.CostEstimate(
            flops=flops, transcendentals=grid_b * tile_b,
            bytes_accessed=bytes_accessed),
    )(x, w1, b1, w2, b2, w3r, b3)

    # (grid_b, tile_b) -> (B, 1); rows past B come from the partial last x
    # block (uninitialized / clipped reads) and are discarded here.
    return out.reshape(-1)[:B].reshape(B, 1)


def init_params(key):
    """Deterministic init matching PyTorch nn.Linear shapes.

    fc1/fc2 weights stored transposed vs PyTorch as (in, out) so the kernel
    does x @ W; fc3 weight kept as a (1, 128) row vector (PyTorch (out, in)).
    """
    def linear_t(key, fan_in, fan_out):
        kw, kb = jax.random.split(key)
        bound = 1.0 / jnp.sqrt(fan_in)
        w = jax.random.uniform(kw, (fan_in, fan_out), jnp.float32, -bound, bound)
        b = jax.random.uniform(kb, (1, fan_out), jnp.float32, -bound, bound)
        return w, b

    k1, k2, k3 = jax.random.split(key, 3)
    w1, b1 = linear_t(k1, 30, 128)
    w2, b2 = linear_t(k2, 128, 128)
    w3_t, b3 = linear_t(k3, 128, 1)      # (128, 1)
    w3 = w3_t.T                          # (1, 128)
    return (w1, b1, w2, b2, w3, b3)


def net_forward_ref(x, params):
    """Pure-JAX f32 reference for correctness checking."""
    w1, b1, w2, b2, w3, b3 = params
    h = jnp.maximum(x @ w1 + b1, 0.0)
    h = jnp.maximum(h @ w2 + b2, 0.0)
    return jax.nn.sigmoid(h @ w3.T + b3)


if __name__ == "__main__":
    key = jax.random.PRNGKey(0)
    kx, kx2, kx3, kp = jax.random.split(key, 4)
    params = init_params(kp)
    kparams = prepare_params(params)   # one-time bf16 / layout conversion

    # Small batch (single tile, tile_b shrinks to 8).
    B = 8
    x = jax.random.normal(kx, (B, 30), jnp.float32)
    out = jax.block_until_ready(net_forward(x, kparams))
    ref = net_forward_ref(x, params)
    assert out.shape == (B, 1)
    assert jnp.allclose(out, ref, atol=1e-2, rtol=1e-2), (out, ref)

    # Mid-size, non-multiple batch: 2 tiles (both v7x cores), partial last block.
    B2 = 300
    x2 = jax.random.normal(kx2, (B2, 30), jnp.float32)
    out2 = jax.block_until_ready(net_forward(x2, kparams))
    ref2 = net_forward_ref(x2, params)
    assert out2.shape == (B2, 1)
    assert jnp.allclose(out2, ref2, atol=1e-2, rtol=1e-2)

    # Larger batch exercising the default 1024 tile + clipped partial block.
    B3 = 2500
    x3 = jax.random.normal(kx3, (B3, 30), jnp.float32)
    out3 = jax.block_until_ready(net_forward(x3, kparams))
    ref3 = net_forward_ref(x3, params)
    assert out3.shape == (B3, 1)
    assert jnp.allclose(out3, ref3, atol=1e-2, rtol=1e-2)

    print("KERNEL_OK")
</pallas_src>

<mosaic_0001>
module attributes {stable_mosaic.version = 11 : i64} {
  func.func @mlp_kernel(%arg0: i32, %arg1: memref<8x30xf32, #tpu.memory_space<vmem>>, %arg2: memref<30x128xbf16, #tpu.memory_space<vmem>>, %arg3: memref<1x128xf32, #tpu.memory_space<vmem>>, %arg4: memref<128x128xbf16, #tpu.memory_space<vmem>>, %arg5: memref<1x128xf32, #tpu.memory_space<vmem>>, %arg6: memref<8x128xf32, #tpu.memory_space<vmem>>, %arg7: memref<1x1xf32, #tpu.memory_space<vmem>>, %arg8: memref<1x8xf32, #tpu.memory_space<vmem>>) attributes {dimension_semantics = [#tpu.dimension_semantics<parallel>], iteration_bounds = array<i64: 1>, scalar_prefetch = 0 : i64, scratch_operands = 0 : i64, tpu.core_type = #tpu.core_type<tc>, window_params = [{transform_indices = @transform_0, window_bounds = array<i64: 8, 30>}, {pipeline_mode = #tpu.pipeline_mode<synchronous>, transform_indices = @transform_1, window_bounds = array<i64: 30, 128>}, {pipeline_mode = #tpu.pipeline_mode<synchronous>, transform_indices = @transform_2, window_bounds = array<i64: 1, 128>}, {pipeline_mode = #tpu.pipeline_mode<synchronous>, transform_indices = @transform_3, window_bounds = array<i64: 128, 128>}, {pipeline_mode = #tpu.pipeline_mode<synchronous>, transform_indices = @transform_4, window_bounds = array<i64: 1, 128>}, {pipeline_mode = #tpu.pipeline_mode<synchronous>, transform_indices = @transform_5, window_bounds = array<i64: 8, 128>}, {pipeline_mode = #tpu.pipeline_mode<synchronous>, transform_indices = @transform_6, window_bounds = array<i64: 1, 1>}, {transform_indices = @transform_7, window_bounds = array<i64: 1, 8>}]} {
    %c0 = arith.constant 0 : index
    %c0_0 = arith.constant 0 : index
    %0 = vector.load %arg1[%c0, %c0_0] : memref<8x30xf32, #tpu.memory_space<vmem>>, vector<8x30xf32>
    %1 = arith.truncf %0 : vector<8x30xf32> to vector<8x30xbf16>
    %c0_1 = arith.constant 0 : index
    %c0_2 = arith.constant 0 : index
    %2 = vector.load %arg2[%c0_1, %c0_2] : memref<30x128xbf16, #tpu.memory_space<vmem>>, vector<30x128xbf16>
    %cst = arith.constant dense<0.000000e+00> : vector<8x128xf32>
    %3 = tpu.matmul %1, %2, %cst {dimension_numbers = #tpu.dot_dimension_numbers<[1], [0], [0], [1], [0, 0, 1, 1], [], []>} : vector<8x30xbf16>, vector<30x128xbf16>, vector<8x128xf32> -> vector<8x128xf32>
    %c0_3 = arith.constant 0 : index
    %c0_4 = arith.constant 0 : index
    %4 = vector.load %arg3[%c0_3, %c0_4] : memref<1x128xf32, #tpu.memory_space<vmem>>, vector<1x128xf32>
    %5 = vector.broadcast %4 : vector<1x128xf32> to vector<8x128xf32>
    %6 = arith.addf %3, %5 : vector<8x128xf32>
    %cst_5 = arith.constant 0.000000e+00 : f32
    %7 = vector.broadcast %cst_5 : f32 to vector<8x128xf32>
    %8 = arith.maximumf %6, %7 : vector<8x128xf32>
    %9 = arith.truncf %8 : vector<8x128xf32> to vector<8x128xbf16>
    %c0_6 = arith.constant 0 : index
    %c0_7 = arith.constant 0 : index
    %10 = vector.load %arg4[%c0_6, %c0_7] : memref<128x128xbf16, #tpu.memory_space<vmem>>, vector<128x128xbf16>
    %cst_8 = arith.constant dense<0.000000e+00> : vector<8x128xf32>
    %11 = tpu.matmul %9, %10, %cst_8 {dimension_numbers = #tpu.dot_dimension_numbers<[1], [0], [0], [1], [0, 0, 1, 1], [], []>} : vector<8x128xbf16>, vector<128x128xbf16>, vector<8x128xf32> -> vector<8x128xf32>
    %c0_9 = arith.constant 0 : index
    %c0_10 = arith.constant 0 : index
    %12 = vector.load %arg5[%c0_9, %c0_10] : memref<1x128xf32, #tpu.memory_space<vmem>>, vector<1x128xf32>
    %13 = vector.broadcast %12 : vector<1x128xf32> to vector<8x128xf32>
    %14 = arith.addf %11, %13 : vector<8x128xf32>
    %cst_11 = arith.constant 0.000000e+00 : f32
    %15 = vector.broadcast %cst_11 : f32 to vector<8x128xf32>
    %16 = arith.maximumf %14, %15 : vector<8x128xf32>
    %c0_12 = arith.constant 0 : index
    %c0_13 = arith.constant 0 : index
    %17 = vector.load %arg6[%c0_12, %c0_13] : memref<8x128xf32, #tpu.memory_space<vmem>>, vector<8x128xf32>
    %cst_14 = arith.constant dense<0.000000e+00> : vector<8x8xf32>
    %18 = tpu.matmul %17, %16, %cst_14 {dimension_numbers = #tpu.dot_dimension_numbers<[1], [1], [0], [0], [0, 0, 1, 0], [], []>} : vector<8x128xf32>, vector<8x128xf32>, vector<8x8xf32> -> vector<8x8xf32>
    %19 = vector.extract_strided_slice %18 {offsets = [0, 0], sizes = [1, 8], strides = [1, 1]} : vector<8x8xf32> to vector<1x8xf32>
    %c0_15 = arith.constant 0 : index
    %c0_16 = arith.constant 0 : index
    %20 = vector.load %arg7[%c0_15, %c0_16] : memref<1x1xf32, #tpu.memory_space<vmem>>, vector<1x1xf32>
    %21 = vector.broadcast %20 : vector<1x1xf32> to vector<1x8xf32>
    %22 = arith.addf %19, %21 : vector<1x8xf32>
    %cst_17 = arith.constant 5.000000e-01 : f32
    %23 = vector.broadcast %cst_17 : f32 to vector<1x8xf32>
    %24 = arith.mulf %23, %22 : vector<1x8xf32>
    %25 = math.tanh %24 : vector<1x8xf32>
    %cst_18 = arith.constant 1.000000e+00 : f32
    %26 = vector.broadcast %cst_18 : f32 to vector<1x8xf32>
    %27 = arith.addf %25, %26 : vector<1x8xf32>
    %cst_19 = arith.constant 5.000000e-01 : f32
    %28 = vector.broadcast %cst_19 : f32 to vector<1x8xf32>
    %29 = arith.mulf %28, %27 : vector<1x8xf32>
    %c0_20 = arith.constant 0 : index
    %c0_21 = arith.constant 0 : index
    %30 = vector.load %arg8[%c0_20, %c0_21] : memref<1x8xf32, #tpu.memory_space<vmem>>, vector<1x8xf32>
    tpu.vector_store %arg8[%c0_20, %c0_21], %29 {strides = array<i32>} : memref<1x8xf32, #tpu.memory_space<vmem>>, vector<1x8xf32>,
    return
  }
  func.func @transform_0(%arg0: i32) -> (i32, i32) {
    %c0_i32 = arith.constant 0 : i32
    %c0_i32_0 = arith.constant 0 : i32
    return %arg0, %c0_i32 : i32, i32
  }
  func.func @transform_1(%arg0: i32) -> (i32, i32) {
    %c0_i32 = arith.constant 0 : i32
    %c0_i32_0 = arith.constant 0 : i32
    %c0_i32_1 = arith.constant 0 : i32
    return %c0_i32, %c0_i32_0 : i32, i32
  }
  func.func @transform_2(%arg0: i32) -> (i32, i32) {
    %c0_i32 = arith.constant 0 : i32
    %c0_i32_0 = arith.constant 0 : i32
    %c0_i32_1 = arith.constant 0 : i32
    return %c0_i32, %c0_i32_0 : i32, i32
  }
  func.func @transform_3(%arg0: i32) -> (i32, i32) {
    %c0_i32 = arith.constant 0 : i32
    %c0_i32_0 = arith.constant 0 : i32
    %c0_i32_1 = arith.constant 0 : i32
    return %c0_i32, %c0_i32_0 : i32, i32
  }
  func.func @transform_4(%arg0: i32) -> (i32, i32) {
    %c0_i32 = arith.constant 0 : i32
    %c0_i32_0 = arith.constant 0 : i32
    %c0_i32_1 = arith.constant 0 : i32
    return %c0_i32, %c0_i32_0 : i32, i32
  }
  func.func @transform_5(%arg0: i32) -> (i32, i32) {
    %c0_i32 = arith.constant 0 : i32
    %c0_i32_0 = arith.constant 0 : i32
    %c0_i32_1 = arith.constant 0 : i32
    return %c0_i32, %c0_i32_0 : i32, i32
  }
  func.func @transform_6(%arg0: i32) -> (i32, i32) {
    %c0_i32 = arith.constant 0 : i32
    %c0_i32_0 = arith.constant 0 : i32
    %c0_i32_1 = arith.constant 0 : i32
    return %c0_i32, %c0_i32_0 : i32, i32
  }
  func.func @transform_7(%arg0: i32) -> (i32, i32) {
    %c0_i32 = arith.constant 0 : i32
    %c0_i32_0 = arith.constant 0 : i32
    return %arg0, %c0_i32 : i32, i32
  }
}

</mosaic_0001>

<bundles_post_ra>
// kernel: tpu_custom_call.1
= control target key start
LH: loop header
LB: loop body
LE: loop exit
PB: predicated region body
PF: predicated region fallthrough
CT: control target
= control target key end

     0   :  { %s653_s0 = inlined_call_operand.hbm [shape: f32[8,30], index: 0, kind: input, shape index: {}]   ;;  %s654_s1 = inlined_call_operand.hbm [shape: bf16[30,128], index: 1, kind: input, shape index: {}]   ;;  %s655_s2 = inlined_call_operand.vmem [shape: f32[1,128], index: 2, kind: input, shape index: {}]   ;;  %s656_s3 = inlined_call_operand.hbm [shape: bf16[128,128], index: 3, kind: input, shape index: {}]   ;;  %s657_s4 = inlined_call_operand.vmem [shape: f32[1,128], index: 4, kind: input, shape index: {}]   ;;  %s658_s5 = inlined_call_operand.vmem [shape: f32[8,128], index: 5, kind: input, shape index: {}]   ;;  %s659_s6 = inlined_call_operand.<no memory space> [shape: f32[1,1], index: 6, kind: input, shape index: {}]   ;;  %s660_s7 = inlined_call_operand.hbm [shape: f32[1,8], index: 7, kind: output, shape index: {}]  }
   0x1   :  { %v12_v0 = vstv %s659_s6 }
   0x2   :  { %13 = vst [vmem:[#allocation2] sm:$0x1] %v12_v0 }
   0x3   :  { %14 = vsyncpa [#allocation4], 0 }
   0x4   :  { %15 = vsyncpa [#allocation7], 0 }
   0x5   :  { %16 = vsyncpa [#allocation5], 0  ;;  %s535_s26 = smov [#allocation6]   ;;  %s441_s30 = scalar_lea.hbm %s654_s1, 256 }
   0x6   :  { %s32_s27 = sshll.u32 %s535_s26, 4  ;;  %p442_p0 = scmp.ne.s32.totalorder %s654_s1, %s441_s30  ;;  %s33_s27 = int_to_ptr.vmem [resolvable:$true] %s32_s27 }
   0x7   :  { %p445_p1 = scmp.lt.u32.totalorder %s441_s30, %s654_s1 }
   0x9   :  { %p447_p2 = pnand %p445_p1, %p442_p0 }
   0xb   :  { %450 = shalt.err (!%p447_p2)
}
   0xc   :  { %s451_s6 = scalar_lea.vmem %s33_s27, 256  ;;  %p456_p4 = scmp.lt.s32.totalorder %s33_s27, %s33_s27 }
   0xd   :  { %p452_p3 = scmp.ne.s32.totalorder %s33_s27, %s451_s6  ;;  %p457_p5 = scmp.lt.s32.totalorder %s451_s6, %s451_s6 }
   0xf   :  { %p458_p6 = por %p457_p5, %p456_p4 }
  0x11   :  { %p459_p7 = pnand %p458_p6, %p452_p3 }
  0x13   :  { %462 = shalt.err (!%p459_p7)
}
  0x14   :  { %s536_s12 = smov 64   ;;  %s537_s13 = smov 4  }
  0x15   :  { %38 = dma.hbm_to_vmem [thread:$0]  %s654_s1, 256, %s33_s27, [#allocation7], %s536_s12, %s536_s12, %s537_s13  }
  0x16   :  { %s538_s16 = smov [#allocation3]   ;;  %s539_s18 = smov [#allocation8]  }
  0x17   :  { %s23_s17 = sshll.u32 %s538_s16, 4  ;;  %s46_s19 = sshll.u32 %s539_s18, 4  ;;  %s24_s17 = int_to_ptr.vmem [resolvable:$true] %s23_s17  ;;  %s47_s19 = int_to_ptr.vmem [resolvable:$true] %s46_s19 }
  0x18   :  { %s463_s22 = scalar_lea.hbm %s653_s0, 128 }
  0x19   :  { %p464_p8 = scmp.ne.s32.totalorder %s653_s0, %s463_s22  ;;  %p467_p9 = scmp.lt.u32.totalorder %s463_s22, %s653_s0 }
  0x1b   :  { %p469_p10 = pnand %p467_p9, %p464_p8 }
  0x1d   :  { %472 = shalt.err (!%p469_p10)
}
  0x1e   :  { %s473_s1 = scalar_lea.vmem %s24_s17, 128  ;;  %p478_p12 = scmp.lt.s32.totalorder %s24_s17, %s24_s17 }
  0x1f   :  { %p474_p11 = scmp.ne.s32.totalorder %s24_s17, %s473_s1  ;;  %p479_p13 = scmp.lt.s32.totalorder %s473_s1, %s473_s1 }
  0x21   :  { %p480_p0 = por %p479_p13, %p478_p12 }
  0x23   :  { %p481_p1 = pnand %p480_p0, %p474_p11 }
  0x25   :  { %484 = shalt.err (!%p481_p1)
}
  0x26   :  { %26 = dma.hbm_to_vmem [thread:$0]  %s653_s0, 128, %s24_s17, [#allocation4]  }
  0x27   :  { %s485_s8 = scalar_lea.hbm %s656_s3, 1024 }
  0x28   :  { %p486_p2 = scmp.ne.s32.totalorder %s656_s3, %s485_s8  ;;  %p489_p3 = scmp.lt.u32.totalorder %s485_s8, %s656_s3 }
  0x2a   :  { %p491_p4 = pnand %p489_p3, %p486_p2 }
  0x2c   :  { %494 = shalt.err (!%p491_p4)
}
  0x2d   :  { %s495_s14 = scalar_lea.vmem %s47_s19, 1024  ;;  %p500_p6 = scmp.lt.s32.totalorder %s47_s19, %s47_s19 }
  0x2e   :  { %p496_p5 = scmp.ne.s32.totalorder %s47_s19, %s495_s14  ;;  %p501_p7 = scmp.lt.s32.totalorder %s495_s14, %s495_s14 }
  0x30   :  { %p502_p8 = por %p501_p7, %p500_p6 }
  0x32   :  { %p503_p9 = pnand %p502_p8, %p496_p5 }
  0x34   :  { %506 = shalt.err (!%p503_p9)
}
  0x35   :  { %52 = dma.hbm_to_vmem [thread:$0]  %s656_s3, 1024, %s47_s19, [#allocation7], %s536_s12, %s536_s12, %s537_s13  }
  0x36   :  { %529 = dma.done.wait [#allocation4], 128  }
  0x37   :  { %530 = vsyncadd [#allocation4], 4294967168 }
  0x38   :  { %531 = dma.done.wait [#allocation7], 1280  }
  0x39   :  { %532 = vsyncadd [#allocation7], 4294966016  ;;  %v540_v1 = vmov 0.0   ;;  %vm541_vm0 = vmmov 0   ;;  %v429_v2 = vld [vmem:[#allocation6] sm:$0xff]   ;;  %vm97_vm1 = vcmask 1046528   ;;  %v332_v33 = vlaneseq }
  0x3a   :  { %386 = vmatprep.subr.bf16.mxu0 %v540_v1  ;;  %390 = vmatprep.mubr.msk.bf16.mxu0 %vm541_vm0, %v540_v1  ;;  %v430_v3 = vld [vmem:[#allocation6 + $0x8] sm:$0x7f]   ;;  %v69_v4 = vld [vmem:[#allocation3] sm:$0xff]  ;;  %v431_v6 = vld [vmem:[#allocation8] sm:$0xff]   ;;  %vm93_vm2 = vcmask 244736   ;;  %v542_v24 = vmov 0  }
  0x3b   :  { %394 = vmatprep.subr.bf16.mxu1 %v540_v1  ;;  %410 = vmatprep.mubr.msk.bf16.mxu1 %vm541_vm0, %v540_v1  ;;  %v99_v5 = vsel %vm97_vm1, %v430_v3, 0  ;;  %v70_v7 = vpack.c.bf16 %v69_v4, %v69_v4  ;;  %v432_v8 = vld [vmem:[#allocation8 + $0x8] sm:$0xff]   ;;  %v433_v9 = vld [vmem:[#allocation8 + $0x10] sm:$0xff]   ;;  %v434_v10 = vld [vmem:[#allocation8 + $0x18] sm:$0xff]   ;;  %v333_v34 = vshrl.u32 %v332_v33, 7  ;;  %vm341_vm3 = vcmask 57344  }
  0x3c   :  { %387 = vmatpush3.bf16.msra.mxu0 %v429_v2  ;;  %395 = vmatpush3.bf16.msra.mxu1 %v431_v6  ;;  %v435_v11 = vld [vmem:[#allocation8 + $0x20] sm:$0xff]   ;;  %v436_v12 = vld [vmem:[#allocation8 + $0x28] sm:$0xff]   ;;  %v437_v13 = vld [vmem:[#allocation8 + $0x30] sm:$0xff]  }
  0x3d   :  { %388 = vmatprep.subr.bf16.mxu0 %v540_v1  ;;  %396 = vmatprep.subr.bf16.mxu1 %v540_v1  ;;  %v438_v14 = vld [vmem:[#allocation8 + $0x38] sm:$0xff]   ;;  %v359_v15 = vld [vmem:[%s655_s2] ss:$0 sm:$0xff]  ;;  %v334_v35 = vsub.s32 0, %v333_v34 }
  0x3e   :  { %v326_v23 = vld [vmem:[#allocation2] sm:$0x1]  ;;  %428 = vset.pattern.permute.xlu0 %v542_v24 }
  0x3f   :  { %329 = vperm.xlu0 %428, %v326_v23   ;;  %v363_v25 = vld [vmem:[%s657_s4] ss:$0 sm:$0xff]  ;;  %s543_s4 = smov [#allocation9]  }
  0x40   :  { %389 = vmatpush3.bf16.msra.mxu0 %v99_v5  ;;  %397 = vmatpush3.bf16.msra.mxu1 %v432_v8  ;;  %v255_v32 = vld [vmem:[%s658_s5] sm:$0xff]  ;;  %s349_s18 = sshll.u32 %s543_s4, 4  ;;  %s350_s18 = int_to_ptr.vmem [resolvable:$true] %s349_s18 }
  0x41   :  { %414 = vmatprep.subr.mxu0 %v540_v1  ;;  %398 = vmatprep.subr.bf16.mxu1 %v540_v1  ;;  %s507_s5 = scalar_lea.vmem %s350_s18, 16  ;;  %s511_s19 = scalar_lea.vmem %s350_s18, 32 }
  0x42   :  { %p508_p10 = scmp.ne.s32.totalorder %s350_s18, %s507_s5  ;;  %p512_p11 = scmp.lt.s32.totalorder %s350_s18, %s350_s18 }
  0x43   :  { %391 = vmatmul.mubr.msk.bf16.vlgmr.msra.gmra.mrb[0].mxu0 %vm93_vm2, %v70_v7  ;;  %p513_p12 = scmp.lt.s32.totalorder %s511_s19, %s507_s5 }
  0x44   :  { %416 = vmatprep.mubr.msk.f32.mxu0 %vm541_vm0, %v540_v1  ;;  %399 = vmatpush3.bf16.msra.mxu1 %v433_v9 }
  0x45   :  { %400 = vmatprep.subr.bf16.mxu1 %v540_v1  ;;  %p514_p13 = por %p513_p12, %p512_p11 }
  0x47   :  { %p515_p0 = pnand %p514_p13, %p508_p10 }
  0x48   :  { %401 = vmatpush3.bf16.msra.mxu1 %v434_v10 }
  0x49   :  { %402 = vmatprep.subr.bf16.mxu1 %v540_v1 }
  0x4c   :  { %403 = vmatpush3.bf16.msra.mxu1 %v435_v11 }
  0x4d   :  { %404 = vmatprep.subr.bf16.mxu1 %v540_v1 }
  0x50   :  { %405 = vmatpush3.bf16.msra.mxu1 %v436_v12 }
  0x51   :  { %406 = vmatprep.subr.bf16.mxu1 %v540_v1 }
  0x54   :  { %407 = vmatpush3.bf16.msra.mxu1 %v437_v13 }
  0x55   :  { %408 = vmatprep.subr.bf16.mxu1 %v540_v1 }
  0x58   :  { %409 = vmatpush3.bf16.msra.mxu1 %v438_v14 }
  0xbe   :  { %v330_v36 = vpop.permute.xlu0 %329 }
  0xbf   :  { %v335_v37 = vrot.slane %v330_v36, %v334_v35 }
 0x116   :  { %v135_v16 = vpop.f32.mrb[0].mxu0 }
 0x117   :  { %v136_v17 = vadd.f32 %v359_v15, %v135_v16  ;;  %v392_v18 = vpop.f32.mrb[1].mxu0 }
 0x118   :  { %v138_v19 = vpop.f32.mrb[2].mxu0 }
 0x119   :  { %v141_v20 = vmax.f32 %v136_v17, 0.0  ;;  %v393_v21 = vpop.f32.mrb[3].mxu0 }
 0x11b   :  { %v142_v22 = vpack.c.bf16 %v141_v20, %v141_v20 }
 0x11d   :  { %411 = vmatmul.mubr.bf16.vlgmr.msra.gmra.mrb[0].mxu1 %v142_v22 }
 0x1f0   :  { %v248_v26 = vpop.f32.mrb[0].mxu1 }
 0x1f1   :  { %v249_v27 = vadd.f32 %v363_v25, %v248_v26  ;;  %v412_v28 = vpop.f32.mrb[1].mxu1 }
 0x1f2   :  { %v251_v29 = vpop.f32.mrb[2].mxu1 }
 0x1f3   :  { %v254_v30 = vmax.f32 %v249_v27, 0.0  ;;  %v413_v31 = vpop.f32.mrb[3].mxu1 }
 0x1f5   :  { %415 = vmatpush3.xpose.msra.mxu0 %v254_v30 }
 0x1f8   :  { %417 = vmatmul.mubr.f32.vlgmr.msra.gmra.mrb[4].mxu0 %v255_v32 }
 0x2cb   :  { %v322_v38 = vpop.f32.mrb[4].mxu0 }
 0x2cc   :  { %v336_v39 = vadd.f32 %v335_v37, %v322_v38  ;;  %v418_v40 = vpop.f32.mrb[5].mxu0 }
 0x2ce   :  { %v337_v41 = vmul.f32 0.5, %v336_v39 }
 0x2d0   :  { %439 = vtanh.f32 %v337_v41 }
 0x2da   :  { %v440_v42 = vpop.eup %439 }
 0x2db   :  { %v339_v43 = vadd.f32 1.0, %v440_v42 }
 0x2dd   :  { %v340_v44 = vmul.f32 0.5, %v339_v43 }
 0x2df   :  { %342 = vst.msk [vmem:[#allocation9] sm:$0x1] %vm341_vm3, %v340_v44 }
 0x2e0   :  { %518 = shalt.err (!%p515_p0)
}
 0x2e1   :  { %s519_s22 = scalar_lea.hbm %s660_s7, 16 }
 0x2e2   :  { %p520_p1 = scmp.ne.s32.totalorder %s660_s7, %s519_s22  ;;  %p523_p2 = scmp.lt.u32.totalorder %s519_s22, %s660_s7 }
 0x2e4   :  { %p525_p3 = pnand %p523_p2, %p520_p1 }
 0x2e6   :  { %528 = shalt.err (!%p525_p3)
}
 0x2e7   :  { %352 = dma.vmem_to_hbm [thread:$0]  %s350_s18, 16, %s660_s7, [#allocation5]  }
 0x2e8   :  { %533 = dma.done.wait [#allocation5], 16  }
 0x2e9   :  { %534 = vsyncadd [#allocation5], 4294967280 }
 0x2ea   :  { %356 = vsyncpa [#allocation4], 1 }
 0x2eb   :  { %357 = vsyncpa [#allocation7], 1 }
 0x2ec   :  { %358 = vsyncpa [#allocation5], 1 }

</bundles_post_ra>
